<compile_context>
chip_gen: v7x
topology: tpu7x:2x2x1
jax: 0.10.0
libtpu: 0.0.40
codegen_flags: <defaults>
</compile_context>

<pallas_src>
import math

import jax
import jax.numpy as jnp
from jax.experimental import pallas as pl
from jax.experimental.pallas import tpu as pltpu


def _round_up(x, m):
    return ((x + m - 1) // m) * m


def _pe_add_kernel(times_ref, xs_ref, pe_ref, o_ref, *, rows, maxtime_pad):
    """One grid step = one tile of `rows` (time, batch) rows.

    times_ref : (rows, 1)            int32  time index per row
    xs_ref    : (rows, D)            float32 input rows
    pe_ref    : (maxtime_pad, D)     float32 full (padded) PE table, VMEM-resident
    o_ref     : (rows, D)            float32 output rows
    """
    idx = times_ref[...]                                             # (rows, 1)
    col = jax.lax.broadcasted_iota(jnp.int32, (rows, maxtime_pad), 1)
    onehot = (col == idx).astype(jnp.float32)                        # (rows, MT)
    # Row gather as a single MXU matmul: (rows, MT) @ (MT, D) -> (rows, D).
    pe_rows = jnp.dot(onehot, pe_ref[...], preferred_element_type=jnp.float32)
    o_ref[...] = (xs_ref[...].astype(jnp.float32) + pe_rows).astype(o_ref.dtype)


def continuous_pos_encoding_pallas(xs, times, pe, *, row_tile=256):
    """xs: (T, B, D) float32, times: (B, T) (any numeric dtype), pe: (maxtime, D).

    Returns (T, B, D): xs + pe[times] (eval-mode dropout == identity).
    """
    T, B, D = xs.shape
    maxtime = pe.shape[0]
    M = T * B

    # --- flatten (time, batch) into rows; row m = t*B + b <-> (t, b) -------------
    xs_flat = xs.reshape(M, D)
    times_i = jnp.transpose(times.astype(jnp.int32))                 # (T, B): [t, b] = times[b, t]
    times_flat = times_i.reshape(M, 1)

    # --- pad rows to a multiple of the row tile ----------------------------------
    r_tile = min(row_tile, _round_up(M, 8))
    m_pad = _round_up(M, r_tile)
    if m_pad != M:
        xs_flat = jnp.pad(xs_flat, ((0, m_pad - M), (0, 0)))
        times_flat = jnp.pad(times_flat, ((0, m_pad - M), (0, 0)))   # padded rows read pe[0]; discarded

    # --- pad the PE table so the matmul K-dim is nicely aligned ------------------
    mt_pad = _round_up(maxtime, 128)
    pe_pad = jnp.pad(pe.astype(jnp.float32), ((0, mt_pad - maxtime), (0, 0)))

    grid = (m_pad // r_tile,)

    kernel = lambda t_ref, x_ref, p_ref, o_ref: _pe_add_kernel(
        t_ref, x_ref, p_ref, o_ref, rows=r_tile, maxtime_pad=mt_pad)

    out_flat = pl.pallas_call(
        kernel,
        out_shape=jax.ShapeDtypeStruct((m_pad, D), xs.dtype),
        grid_spec=pltpu.PrefetchScalarGridSpec(
            num_scalar_prefetch=0,
            grid=grid,
            in_specs=[
                pl.BlockSpec((r_tile, 1), lambda i: (i, 0)),         # times
                pl.BlockSpec((r_tile, D), lambda i: (i, 0)),         # xs rows
                pl.BlockSpec((mt_pad, D), lambda i: (0, 0)),         # pe table (resident)
            ],
            out_specs=pl.BlockSpec((r_tile, D), lambda i: (i, 0)),
        ),
        compiler_params=pltpu.CompilerParams(
            dimension_semantics=("parallel",)),
    )(times_flat, xs_flat, pe_pad)

    return out_flat[:M].reshape(T, B, D)


# ------------------------------- reference & setup -------------------------------
def make_pe_table(maxtime, dim):
    """Same construction as the PyTorch module's registered buffer `pe`."""
    position = jnp.arange(maxtime, dtype=jnp.float32)[:, None]        # (maxtime, 1)
    div_term = jnp.exp(jnp.arange(0, dim, 2, dtype=jnp.float32) *
                       (-math.log(10000.0) / dim))                    # (dim//2,)
    ang = position * div_term                                         # (maxtime, dim//2)
    pe = jnp.zeros((maxtime, dim), jnp.float32)
    pe = pe.at[:, 0::2].set(jnp.sin(ang))
    pe = pe.at[:, 1::2].set(jnp.cos(ang))
    return pe


def _reference(xs, times, pe):
    """Pure-JAX reference of the PyTorch forward (eval mode: dropout = identity)."""
    idx = times.astype(jnp.int32)                                     # (B, T)
    pe_g = pe[idx]                                                    # (B, T, D)
    return xs + jnp.transpose(pe_g, (1, 0, 2))                        # (T, B, D)


if __name__ == "__main__":
    # Small shapes consistent with the module: seq T=8, batch B=2, dim D=128, maxtime=240.
    T, B, D, MAXTIME = 8, 2, 128, 240
    key = jax.random.PRNGKey(0)
    kx, kt = jax.random.split(key)

    xs = jax.random.normal(kx, (T, B, D), jnp.float32)
    # times arrive as floats in the original model; forward calls .long() on them.
    times = jax.random.randint(kt, (B, T), 0, MAXTIME).astype(jnp.float32)
    pe = make_pe_table(MAXTIME, D)

    out = continuous_pos_encoding_pallas(xs, times, pe)
    out = jax.block_until_ready(out)

    ref = _reference(xs, times, pe)
    assert out.shape == (T, B, D), out.shape
    assert jnp.allclose(out, ref, atol=1e-5, rtol=1e-5), float(
        jnp.max(jnp.abs(out - ref)))
    print("KERNEL_OK")
</pallas_src>

<mosaic_0001>
module attributes {stable_mosaic.version = 11 : i64} {
  func.func @_lambda_(%arg0: i32, %arg1: memref<16x1xi32, #tpu.memory_space<vmem>>, %arg2: memref<16x128xf32, #tpu.memory_space<vmem>>, %arg3: memref<256x128xf32, #tpu.memory_space<vmem>>, %arg4: memref<16x128xf32, #tpu.memory_space<vmem>>) attributes {dimension_semantics = [#tpu.dimension_semantics<parallel>], iteration_bounds = array<i64: 1>, scalar_prefetch = 0 : i64, scratch_operands = 0 : i64, tpu.core_type = #tpu.core_type<tc>, window_params = [{transform_indices = @transform_0, window_bounds = array<i64: 16, 1>}, {transform_indices = @transform_1, window_bounds = array<i64: 16, 128>}, {pipeline_mode = #tpu.pipeline_mode<synchronous>, transform_indices = @transform_2, window_bounds = array<i64: 256, 128>}, {transform_indices = @transform_3, window_bounds = array<i64: 16, 128>}]} {
    %c0 = arith.constant 0 : index
    %c0_0 = arith.constant 0 : index
    %0 = vector.load %arg1[%c0, %c0_0] : memref<16x1xi32, #tpu.memory_space<vmem>>, vector<16x1xi32>
    %1 = tpu.iota {dimensions = array<i32: 1>} : vector<16x256xi32>
    %2 = vector.broadcast %0 : vector<16x1xi32> to vector<16x256xi32>
    %3 = arith.cmpi eq, %1, %2 : vector<16x256xi32>
    %4 = arith.extui %3 : vector<16x256xi1> to vector<16x256xi32>
    %5 = arith.sitofp %4 : vector<16x256xi32> to vector<16x256xf32>
    %c0_1 = arith.constant 0 : index
    %c0_2 = arith.constant 0 : index
    %6 = vector.load %arg3[%c0_1, %c0_2] : memref<256x128xf32, #tpu.memory_space<vmem>>, vector<256x128xf32>
    %cst = arith.constant dense<0.000000e+00> : vector<16x128xf32>
    %7 = tpu.matmul %5, %6, %cst {dimension_numbers = #tpu.dot_dimension_numbers<[1], [0], [0], [1], [0, 0, 1, 1], [], []>} : vector<16x256xf32>, vector<256x128xf32>, vector<16x128xf32> -> vector<16x128xf32>
    %c0_3 = arith.constant 0 : index
    %c0_4 = arith.constant 0 : index
    %8 = vector.load %arg2[%c0_3, %c0_4] : memref<16x128xf32, #tpu.memory_space<vmem>>, vector<16x128xf32>
    %9 = arith.addf %8, %7 : vector<16x128xf32>
    %c0_5 = arith.constant 0 : index
    %c0_6 = arith.constant 0 : index
    %10 = vector.load %arg4[%c0_5, %c0_6] : memref<16x128xf32, #tpu.memory_space<vmem>>, vector<16x128xf32>
    tpu.vector_store %arg4[%c0_5, %c0_6], %9 {strides = array<i32>} : memref<16x128xf32, #tpu.memory_space<vmem>>, vector<16x128xf32>,
    return
  }
  func.func @transform_0(%arg0: i32) -> (i32, i32) {
    %c0_i32 = arith.constant 0 : i32
    %c0_i32_0 = arith.constant 0 : i32
    return %arg0, %c0_i32 : i32, i32
  }
  func.func @transform_1(%arg0: i32) -> (i32, i32) {
    %c0_i32 = arith.constant 0 : i32
    %c0_i32_0 = arith.constant 0 : i32
    return %arg0, %c0_i32 : i32, i32
  }
  func.func @transform_2(%arg0: i32) -> (i32, i32) {
    %c0_i32 = arith.constant 0 : i32
    %c0_i32_0 = arith.constant 0 : i32
    %c0_i32_1 = arith.constant 0 : i32
    return %c0_i32, %c0_i32_0 : i32, i32
  }
  func.func @transform_3(%arg0: i32) -> (i32, i32) {
    %c0_i32 = arith.constant 0 : i32
    %c0_i32_0 = arith.constant 0 : i32
    return %arg0, %c0_i32 : i32, i32
  }
}

</mosaic_0001>

<bundles_post_ra>
// kernel: tpu_custom_call.1
= control target key start
LH: loop header
LB: loop body
LE: loop exit
PB: predicated region body
PF: predicated region fallthrough
CT: control target
= control target key end

     0   :  { %8 = vsyncpa [#allocation3], 0  ;;  %s399_s0 = inlined_call_operand.vmem [shape: s32[16,1], index: 0, kind: input, shape index: {}]   ;;  %s400_s1 = inlined_call_operand.vmem [shape: f32[16,128], index: 1, kind: input, shape index: {}]   ;;  %s401_s2 = inlined_call_operand.hbm [shape: f32[256,128], index: 2, kind: input, shape index: {}]   ;;  %s402_s3 = inlined_call_operand.hbm [shape: f32[16,128], index: 3, kind: output, shape index: {}]  }
   0x1   :  { %9 = vsyncpa [#allocation4], 0  ;;  %s331_s12 = smov [#allocation2]   ;;  %s283_s16 = scalar_lea.hbm %s401_s2, 4096 }
   0x2   :  { %s19_s13 = sshll.u32 %s331_s12, 4  ;;  %p284_p0 = scmp.ne.s32.totalorder %s401_s2, %s283_s16  ;;  %s20_s13 = int_to_ptr.vmem [resolvable:$true] %s19_s13 }
   0x3   :  { %p287_p1 = scmp.lt.u32.totalorder %s283_s16, %s401_s2 }
   0x5   :  { %p289_p2 = pnand %p287_p1, %p284_p0 }
   0x7   :  { %292 = shalt.err (!%p289_p2)
}
   0x8   :  { %s293_s21 = scalar_lea.vmem %s20_s13, 4096  ;;  %p298_p4 = scmp.lt.s32.totalorder %s20_s13, %s20_s13 }
   0x9   :  { %p294_p3 = scmp.ne.s32.totalorder %s20_s13, %s293_s21  ;;  %p299_p5 = scmp.lt.s32.totalorder %s293_s21, %s293_s21 }
   0xb   :  { %p300_p6 = por %p299_p5, %p298_p4 }
   0xd   :  { %p301_p7 = pnand %p300_p6, %p294_p3 }
   0xf   :  { %304 = shalt.err (!%p301_p7)
}
  0x10   :  { %s332_s22 = smov 128   ;;  %s333_s23 = smov 8  }
  0x11   :  { %25 = dma.hbm_to_vmem [thread:$0]  %s401_s2, 4096, %s20_s13, [#allocation3], %s332_s22, %s332_s22, %s333_s23  }
  0x12   :  { %327 = dma.done.wait [#allocation3], 4096  }
  0x13   :  { %328 = vsyncadd [#allocation3], 4294963200  ;;  %v334_v0 = vmov 0   ;;  %v29_v1 = vld [vmem:[%s399_s0] sm:$0xff]  ;;  %v30_v2 = vld [vmem:[%s399_s0 + $0x8] sm:$0xff]  ;;  %v31_v51 = vlaneseq  ;;  %v335_v55 = vmov 1.0  }
  0x14   :  { %282 = vset.pattern.permute.xlu0 %v334_v0  ;;  %v68_v3 = vld [vmem:[#allocation2 + $0x80] sm:$0xff]  ;;  %v69_v4 = vld [vmem:[#allocation2 + $0x88] sm:$0xff]  ;;  %v70_v9 = vld [vmem:[#allocation2 + $0x90] sm:$0xff]  ;;  %s336_s5 = smov [#allocation5]  }
  0x15   :  { %35 = vperm.xlu0 %282, %v29_v1   ;;  %v52_v5 = vld [vmem:[#allocation2] sm:$0xff]  ;;  %v53_v6 = vld [vmem:[#allocation2 + $0x8] sm:$0xff]  ;;  %v228_v7 = vpack.c.bf16 %v69_v4, %v68_v3  ;;  %v71_v10 = vld [vmem:[#allocation2 + $0x98] sm:$0xff]  ;;  %v32_v52 = vand.u32 127, %v31_v51  ;;  %s170_s6 = sshll.u32 %s336_s5, 4  ;;  %s171_s6 = int_to_ptr.vmem [resolvable:$true] %s170_s6 }
  0x16   :  { %v230_v8 = vpack.c.bf16 %v53_v6, %v52_v5  ;;  %v54_v11 = vld [vmem:[#allocation2 + $0x10] sm:$0xff]  ;;  %v232_v12 = vpack.c.bf16 %v71_v10, %v70_v9  ;;  %v55_v13 = vld [vmem:[#allocation2 + $0x18] sm:$0xff]  ;;  %v72_v14 = vld [vmem:[#allocation2 + $0xa0] sm:$0xff]  ;;  %s305_s7 = scalar_lea.vmem %s171_s6, 256  ;;  %p310_p9 = scmp.lt.s32.totalorder %s171_s6, %s171_s6 }
  0x17   :  { %v73_v15 = vld [vmem:[#allocation2 + $0xa8] sm:$0xff]  ;;  %229 = vmatprep.subr.bf16.mxu0 %v228_v7  ;;  %260 = vmatprep.subr.bf16.mxu1 %v228_v7  ;;  %v234_v16 = vpack.c.bf16 %v55_v13, %v54_v11  ;;  %v56_v18 = vld [vmem:[#allocation2 + $0x20] sm:$0xff]  ;;  %v74_v20 = vld [vmem:[#allocation2 + $0xb0] sm:$0xff]  ;;  %v33_v53 = vadd.s32 128, %v32_v52  ;;  %p306_p8 = scmp.ne.s32.totalorder %s171_s6, %s305_s7  ;;  %p311_p10 = scmp.lt.s32.totalorder %s305_s7, %s305_s7 }
  0x18   :  { %231 = vmatpush3.bf16.msra.mxu0 %v230_v8  ;;  %268 = vmatpush3.bf16.msra.mxu1 %v230_v8  ;;  %v236_v17 = vpack.c.bf16 %v73_v15, %v72_v14  ;;  %v57_v19 = vld [vmem:[#allocation2 + $0x28] sm:$0xff]  ;;  %v75_v21 = vld [vmem:[#allocation2 + $0xb8] sm:$0xff]  ;;  %v58_v24 = vld [vmem:[#allocation2 + $0x30] sm:$0xff] }
  0x19   :  { %38 = vperm.xlu0 %282, %v30_v2   ;;  %233 = vmatprep.subr.bf16.mxu0 %v232_v12  ;;  %v238_v22 = vpack.c.bf16 %v57_v19, %v56_v18  ;;  %v240_v23 = vpack.c.bf16 %v75_v21, %v74_v20  ;;  %v59_v25 = vld [vmem:[#allocation2 + $0x38] sm:$0xff]  ;;  %v76_v26 = vld [vmem:[#allocation2 + $0xc0] sm:$0xff]  ;;  %v77_v27 = vld [vmem:[#allocation2 + $0xc8] sm:$0xff]  ;;  %p312_p11 = por %p311_p10, %p310_p9 }
  0x1a   :  { %261 = vmatprep.subr.bf16.mxu1 %v232_v12  ;;  %v242_v28 = vpack.c.bf16 %v59_v25, %v58_v24  ;;  %v244_v29 = vpack.c.bf16 %v77_v27, %v76_v26  ;;  %v60_v30 = vld [vmem:[#allocation2 + $0x40] sm:$0xff]  ;;  %v61_v31 = vld [vmem:[#allocation2 + $0x48] sm:$0xff]  ;;  %v78_v32 = vld [vmem:[#allocation2 + $0xd0] sm:$0xff] }
  0x1b   :  { %v79_v33 = vld [vmem:[#allocation2 + $0xd8] sm:$0xff]  ;;  %v246_v34 = vpack.c.bf16 %v61_v31, %v60_v30  ;;  %v62_v36 = vld [vmem:[#allocation2 + $0x50] sm:$0xff]  ;;  %v80_v38 = vld [vmem:[#allocation2 + $0xe0] sm:$0xff]  ;;  %p313_p12 = pnand %p312_p11, %p306_p8 }
  0x1c   :  { %235 = vmatpush3.bf16.msra.mxu0 %v234_v16  ;;  %269 = vmatpush3.bf16.msra.mxu1 %v234_v16  ;;  %v248_v35 = vpack.c.bf16 %v79_v33, %v78_v32  ;;  %v63_v37 = vld [vmem:[#allocation2 + $0x58] sm:$0xff]  ;;  %v81_v39 = vld [vmem:[#allocation2 + $0xe8] sm:$0xff]  ;;  %v64_v42 = vld [vmem:[#allocation2 + $0x60] sm:$0xff] }
  0x1d   :  { %237 = vmatprep.subr.bf16.mxu0 %v236_v17  ;;  %262 = vmatprep.subr.bf16.mxu1 %v236_v17  ;;  %v250_v40 = vpack.c.bf16 %v63_v37, %v62_v36  ;;  %v252_v41 = vpack.c.bf16 %v81_v39, %v80_v38  ;;  %v65_v43 = vld [vmem:[#allocation2 + $0x68] sm:$0xff]  ;;  %v82_v44 = vld [vmem:[#allocation2 + $0xf0] sm:$0xff]  ;;  %v83_v45 = vld [vmem:[#allocation2 + $0xf8] sm:$0xff] }
  0x1e   :  { %v254_v46 = vpack.c.bf16 %v65_v43, %v64_v42  ;;  %v256_v47 = vpack.c.bf16 %v83_v45, %v82_v44  ;;  %v66_v48 = vld [vmem:[#allocation2 + $0x70] sm:$0xff]  ;;  %v67_v49 = vld [vmem:[#allocation2 + $0x78] sm:$0xff]  ;;  %v159_v59 = vld [vmem:[%s400_s1] sm:$0xff] }
  0x1f   :  { %v258_v50 = vpack.c.bf16 %v67_v49, %v66_v48  ;;  %v160_v0 = vld [vmem:[%s400_s1 + $0x8] sm:$0xff] }
  0x20   :  { %239 = vmatpush3.bf16.msra.mxu0 %v238_v22  ;;  %270 = vmatpush3.bf16.msra.mxu1 %v238_v22 }
  0x21   :  { %241 = vmatprep.subr.bf16.mxu0 %v240_v23  ;;  %263 = vmatprep.subr.bf16.mxu1 %v240_v23 }
  0x24   :  { %243 = vmatpush3.bf16.msra.mxu0 %v242_v28  ;;  %271 = vmatpush3.bf16.msra.mxu1 %v242_v28 }
  0x25   :  { %245 = vmatprep.subr.bf16.mxu0 %v244_v29  ;;  %264 = vmatprep.subr.bf16.mxu1 %v244_v29 }
  0x28   :  { %247 = vmatpush3.bf16.msra.mxu0 %v246_v34  ;;  %272 = vmatpush3.bf16.msra.mxu1 %v246_v34 }
  0x29   :  { %249 = vmatprep.subr.bf16.mxu0 %v248_v35  ;;  %265 = vmatprep.subr.bf16.mxu1 %v248_v35 }
  0x2c   :  { %251 = vmatpush3.bf16.msra.mxu0 %v250_v40  ;;  %273 = vmatpush3.bf16.msra.mxu1 %v250_v40 }
  0x2d   :  { %253 = vmatprep.subr.bf16.mxu0 %v252_v41  ;;  %266 = vmatprep.subr.bf16.mxu1 %v252_v41 }
  0x30   :  { %255 = vmatpush3.bf16.msra.mxu0 %v254_v46  ;;  %274 = vmatpush3.bf16.msra.mxu1 %v254_v46 }
  0x31   :  { %257 = vmatprep.subr.bf16.mxu0 %v256_v47  ;;  %267 = vmatprep.subr.bf16.mxu1 %v256_v47 }
  0x34   :  { %259 = vmatpush3.bf16.msra.mxu0 %v258_v50  ;;  %275 = vmatpush3.bf16.msra.mxu1 %v258_v50 }
  0x94   :  { %v36_v54 = vpop.permute.xlu0 %35 }
  0x95   :  { %vm40_vm0 = vcmp.eq.s32.totalorder %v32_v52, %v36_v54  ;;  %vm41_vm1 = vcmp.eq.s32.totalorder %v33_v53, %v36_v54 }
  0x96   :  { %186 = vmatprep.mubr.msk.f32.mxu0 %vm41_vm1, %v335_v55 }
  0x97   :  { %187 = vmatmul.mubr.msk.f32.vlgmr.msra.gmra.mrb[0].mxu0 %vm40_vm0, %v335_v55 }
  0x98   :  { %v39_v56 = vpop.permute.xlu0 %38 }
  0x99   :  { %vm42_vm2 = vcmp.eq.s32.totalorder %v32_v52, %v39_v56  ;;  %vm43_vm3 = vcmp.eq.s32.totalorder %v33_v53, %v39_v56 }
  0x9a   :  { %188 = vmatprep.mubr.msk.f32.mxu1 %vm43_vm3, %v335_v55 }
  0x9b   :  { %189 = vmatmul.mubr.msk.f32.vlgmr.msra.gmra.mrb[0].mxu1 %vm42_vm2, %v335_v55 }
 0x16a   :  { %v222_v57 = vpop.f32.mrb[0].mxu0 }
 0x16b   :  { %v223_v58 = vpop.f32.mrb[1].mxu0 }
 0x16c   :  { %v224_v60 = vadd.f32 %v223_v58, %v222_v57 }
 0x16e   :  { %v161_v61 = vadd.f32 %v224_v60, %v159_v59  ;;  %v225_v62 = vpop.f32.mrb[0].mxu1 }
 0x16f   :  { %v226_v63 = vpop.f32.mrb[1].mxu1 }
 0x170   :  { %163 = vst [vmem:[#allocation5] sm:$0xff] %v161_v61  ;;  %v227_v1 = vadd.f32 %v226_v63, %v225_v62 }
 0x172   :  { %v162_v2 = vadd.f32 %v227_v1, %v160_v0 }
 0x174   :  { %164 = vst [vmem:[#allocation5 + $0x8] sm:$0xff] %v162_v2 }
 0x175   :  { %316 = shalt.err (!%p313_p12)
}
 0x176   :  { %s317_s10 = scalar_lea.hbm %s402_s3, 256 }
 0x177   :  { %p318_p13 = scmp.ne.s32.totalorder %s402_s3, %s317_s10  ;;  %p321_p0 = scmp.lt.u32.totalorder %s317_s10, %s402_s3 }
 0x179   :  { %p323_p1 = pnand %p321_p0, %p318_p13 }
 0x17b   :  { %326 = shalt.err (!%p323_p1)
}
 0x17c   :  { %176 = dma.vmem_to_hbm [thread:$0]  %s171_s6, 256, %s402_s3, [#allocation4], %s332_s22, %s332_s22, %s333_s23  }
 0x17d   :  { %329 = dma.done.wait [#allocation4], 256  }
 0x17e   :  { %330 = vsyncadd [#allocation4], 4294967040 }
 0x17f   :  { %180 = vsyncpa [#allocation3], 1 }
 0x180   :  { %181 = vsyncpa [#allocation4], 1 }

</bundles_post_ra>
